<compile_context>
chip_gen: v6e
topology: v6e:2x2x1
jax: 0.10.0
libtpu: 0.0.40
codegen_flags: <defaults>
</compile_context>

<pallas_src>
import jax
import jax.numpy as jnp
from jax.experimental import pallas as pl
from jax.experimental.pallas import tpu as pltpu

INPUT_SIZE = 3
HIDDEN = 50
OUT = 1


def _round_up(n, m):
    return ((n + m - 1) // m) * m


def mlp_kernel(xt_ref, w1_ref, b1_ref, w2_ref, b2_ref, ot_ref):
    # xt_ref: (INPUT_SIZE, TB)   batch on lanes
    # w1_ref: (HIDDEN, INPUT_SIZE)   (= torch fc1.weight)
    # b1_ref: (HIDDEN, 1)
    # w2_ref: (OUT, HIDDEN)          (= torch fc2.weight)
    # b2_ref: (1, 1) scalar in SMEM
    # ot_ref: (OUT, TB)          lane-dense output
    xt = xt_ref[...]
    h = jnp.dot(w1_ref[...], xt, preferred_element_type=jnp.float32) + b1_ref[...]
    h = jnp.maximum(h, 0.0)                                   # ReLU
    y = jnp.dot(w2_ref[...], h, preferred_element_type=jnp.float32) + b2_ref[0, 0]
    ot_ref[...] = jnp.exp(y)                                  # torch.exp


def ann_model_forward(x, w1, b1, w2, b2, *, block_b=1024):
    """Forward pass of ANNModel.

    x:  (B, INPUT_SIZE) float32
    w1: (HIDDEN, INPUT_SIZE), b1: (HIDDEN,)   -- torch fc1.weight / fc1.bias layout
    w2: (OUT, HIDDEN),        b2: (OUT,)      -- torch fc2.weight / fc2.bias layout
    returns (B, OUT)
    """
    B = x.shape[0]
    # Batch tile: multiple of 128 lanes, sized modestly so double-buffered tiles fit
    # comfortably inside v7x's smaller (32 MiB scoped) VMEM as well as v5e/v6e.
    tb = min(_round_up(block_b, 128), _round_up(B, 128))
    b_pad = _round_up(B, tb)

    # Transpose + pad in the wrapper so the kernel sees a lane-dense (INPUT_SIZE, B_pad)
    # slab; padded columns are zeros (harmless, sliced off below).
    xt = jnp.zeros((INPUT_SIZE, b_pad), dtype=jnp.float32).at[:, :B].set(
        x.astype(jnp.float32).T
    )
    w1f = w1.astype(jnp.float32)
    b1c = b1.astype(jnp.float32).reshape(HIDDEN, 1)
    w2f = w2.astype(jnp.float32)
    b2s = b2.astype(jnp.float32).reshape(1, 1)

    grid = (b_pad // tb,)

    out_t = pl.pallas_call(
        mlp_kernel,
        out_shape=jax.ShapeDtypeStruct((OUT, b_pad), jnp.float32),
        grid_spec=pltpu.PrefetchScalarGridSpec(
            num_scalar_prefetch=0,
            grid=grid,
            in_specs=[
                # batch-tiled, lane-dense input
                pl.BlockSpec((INPUT_SIZE, tb), lambda i: (0, i)),
                # weights / bias resident in VMEM across the whole grid
                pl.BlockSpec((HIDDEN, INPUT_SIZE), lambda i: (0, 0)),
                pl.BlockSpec((HIDDEN, 1), lambda i: (0, 0)),
                pl.BlockSpec((OUT, HIDDEN), lambda i: (0, 0)),
                # b2 is a single scalar -> SMEM, no padded VMEM tile / DMA
                pl.BlockSpec(memory_space=pltpu.MemorySpace.SMEM),
            ],
            out_specs=pl.BlockSpec((OUT, tb), lambda i: (0, i)),
        ),
        compiler_params=pltpu.CompilerParams(
            # batch tiles are independent -> parallel (megacore sharding on v7x)
            dimension_semantics=("parallel",),
        ),
    )(xt, w1f, b1c, w2f, b2s)

    return out_t[:, :B].T  # (B, OUT)


def init_params(key):
    # Deterministic init mimicking nn.Linear default: U(-1/sqrt(fan_in), +1/sqrt(fan_in)),
    # stored in the PyTorch (out_features, in_features) layout.
    k1, k2, k3, k4 = jax.random.split(key, 4)
    bound1 = 1.0 / jnp.sqrt(float(INPUT_SIZE))
    bound2 = 1.0 / jnp.sqrt(float(HIDDEN))
    w1 = jax.random.uniform(k1, (HIDDEN, INPUT_SIZE), jnp.float32, -bound1, bound1)
    b1 = jax.random.uniform(k2, (HIDDEN,), jnp.float32, -bound1, bound1)
    w2 = jax.random.uniform(k3, (OUT, HIDDEN), jnp.float32, -bound2, bound2)
    b2 = jax.random.uniform(k4, (OUT,), jnp.float32, -bound2, bound2)
    return w1, b1, w2, b2


def reference_forward(x, w1, b1, w2, b2):
    h = jnp.maximum(x @ w1.T + b1, 0.0)
    return jnp.exp(h @ w2.T + b2)


if __name__ == "__main__":
    key = jax.random.PRNGKey(0)
    kx, kp = jax.random.split(key)
    w1, b1, w2, b2 = init_params(kp)

    # Small-batch check (single grid tile).
    batch = 8
    x = jax.random.normal(kx, (batch, INPUT_SIZE), dtype=jnp.float32)
    out = jax.block_until_ready(ann_model_forward(x, w1, b1, w2, b2))
    ref = reference_forward(x, w1, b1, w2, b2)
    assert out.shape == (batch, OUT)
    assert jnp.allclose(out, ref, rtol=1e-5, atol=1e-5), "Pallas output mismatch (batch=8)"

    # Multi-tile check: exercises the parallel batch grid + padding path.
    batch2 = 300
    x2 = jax.random.normal(kx, (batch2, INPUT_SIZE), dtype=jnp.float32)
    out2 = jax.block_until_ready(ann_model_forward(x2, w1, b1, w2, b2, block_b=128))
    ref2 = reference_forward(x2, w1, b1, w2, b2)
    assert out2.shape == (batch2, OUT)
    assert jnp.allclose(out2, ref2, rtol=1e-5, atol=1e-5), "Pallas output mismatch (batch=300)"

    print("KERNEL_OK")
</pallas_src>

<mosaic_0001>
module attributes {stable_mosaic.version = 11 : i64} {
  func.func @mlp_kernel(%arg0: i32, %arg1: memref<3x128xf32, #tpu.memory_space<vmem>>, %arg2: memref<50x3xf32, #tpu.memory_space<vmem>>, %arg3: memref<50x1xf32, #tpu.memory_space<vmem>>, %arg4: memref<1x50xf32, #tpu.memory_space<vmem>>, %arg5: memref<1x1xf32, #tpu.memory_space<smem>>, %arg6: memref<1x128xf32, #tpu.memory_space<vmem>>) attributes {dimension_semantics = [#tpu.dimension_semantics<parallel>], iteration_bounds = array<i64: 1>, scalar_prefetch = 0 : i64, scratch_operands = 0 : i64, tpu.core_type = #tpu.core_type<tc>, window_params = [{transform_indices = @transform_0, window_bounds = array<i64: 3, 128>}, {pipeline_mode = #tpu.pipeline_mode<synchronous>, transform_indices = @transform_1, window_bounds = array<i64: 50, 3>}, {pipeline_mode = #tpu.pipeline_mode<synchronous>, transform_indices = @transform_2, window_bounds = array<i64: 50, 1>}, {pipeline_mode = #tpu.pipeline_mode<synchronous>, transform_indices = @transform_3, window_bounds = array<i64: 1, 50>}, {transform_indices = @transform_4, window_bounds = array<i64: 1, 1>}, {transform_indices = @transform_5, window_bounds = array<i64: 1, 128>}]} {
    %c0 = arith.constant 0 : index
    %c0_0 = arith.constant 0 : index
    %0 = vector.load %arg1[%c0, %c0_0] : memref<3x128xf32, #tpu.memory_space<vmem>>, vector<3x128xf32>
    %c0_1 = arith.constant 0 : index
    %c0_2 = arith.constant 0 : index
    %1 = vector.load %arg2[%c0_1, %c0_2] : memref<50x3xf32, #tpu.memory_space<vmem>>, vector<50x3xf32>
    %cst = arith.constant dense<0.000000e+00> : vector<50x128xf32>
    %2 = tpu.matmul %1, %0, %cst {dimension_numbers = #tpu.dot_dimension_numbers<[1], [0], [0], [1], [0, 0, 1, 1], [], []>} : vector<50x3xf32>, vector<3x128xf32>, vector<50x128xf32> -> vector<50x128xf32>
    %c0_3 = arith.constant 0 : index
    %c0_4 = arith.constant 0 : index
    %3 = vector.load %arg3[%c0_3, %c0_4] : memref<50x1xf32, #tpu.memory_space<vmem>>, vector<50x1xf32>
    %4 = vector.broadcast %3 : vector<50x1xf32> to vector<50x128xf32>
    %5 = arith.addf %2, %4 : vector<50x128xf32>
    %cst_5 = arith.constant 0.000000e+00 : f32
    %6 = vector.broadcast %cst_5 : f32 to vector<50x128xf32>
    %7 = arith.maximumf %5, %6 : vector<50x128xf32>
    %c0_6 = arith.constant 0 : index
    %c0_7 = arith.constant 0 : index
    %8 = vector.load %arg4[%c0_6, %c0_7] : memref<1x50xf32, #tpu.memory_space<vmem>>, vector<1x50xf32>
    %cst_8 = arith.constant dense<0.000000e+00> : vector<1x128xf32>
    %9 = tpu.matmul %8, %7, %cst_8 {dimension_numbers = #tpu.dot_dimension_numbers<[1], [0], [0], [1], [0, 0, 1, 1], [], []>} : vector<1x50xf32>, vector<50x128xf32>, vector<1x128xf32> -> vector<1x128xf32>
    %c0_9 = arith.constant 0 : index
    %c0_10 = arith.constant 0 : index
    %10 = memref.load %arg5[%c0_9, %c0_10] : memref<1x1xf32, #tpu.memory_space<smem>>
    %11 = vector.broadcast %10 : f32 to vector<1x128xf32>
    %12 = arith.addf %9, %11 : vector<1x128xf32>
    %13 = math.exp %12 : vector<1x128xf32>
    %c0_11 = arith.constant 0 : index
    %c0_12 = arith.constant 0 : index
    %14 = vector.load %arg6[%c0_11, %c0_12] : memref<1x128xf32, #tpu.memory_space<vmem>>, vector<1x128xf32>
    tpu.vector_store %arg6[%c0_11, %c0_12], %13 {strides = array<i32>} : memref<1x128xf32, #tpu.memory_space<vmem>>, vector<1x128xf32>,
    return
  }
  func.func @transform_0(%arg0: i32) -> (i32, i32) {
    %c0_i32 = arith.constant 0 : i32
    %c0_i32_0 = arith.constant 0 : i32
    return %c0_i32, %arg0 : i32, i32
  }
  func.func @transform_1(%arg0: i32) -> (i32, i32) {
    %c0_i32 = arith.constant 0 : i32
    %c0_i32_0 = arith.constant 0 : i32
    %c0_i32_1 = arith.constant 0 : i32
    return %c0_i32, %c0_i32_0 : i32, i32
  }
  func.func @transform_2(%arg0: i32) -> (i32, i32) {
    %c0_i32 = arith.constant 0 : i32
    %c0_i32_0 = arith.constant 0 : i32
    %c0_i32_1 = arith.constant 0 : i32
    return %c0_i32, %c0_i32_0 : i32, i32
  }
  func.func @transform_3(%arg0: i32) -> (i32, i32) {
    %c0_i32 = arith.constant 0 : i32
    %c0_i32_0 = arith.constant 0 : i32
    %c0_i32_1 = arith.constant 0 : i32
    return %c0_i32, %c0_i32_0 : i32, i32
  }
  func.func @transform_4(%arg0: i32) -> (i32, i32) {
    %c0_i32 = arith.constant 0 : i32
    %c0_i32_0 = arith.constant 0 : i32
    %c0_i32_1 = arith.constant 0 : i32
    return %c0_i32, %c0_i32_0 : i32, i32
  }
  func.func @transform_5(%arg0: i32) -> (i32, i32) {
    %c0_i32 = arith.constant 0 : i32
    %c0_i32_0 = arith.constant 0 : i32
    return %c0_i32, %arg0 : i32, i32
  }
}

</mosaic_0001>

<bundles_post_ra>
// kernel: tpu_custom_call.1
= control target key start
LH: loop header
LB: loop body
LE: loop exit
PB: predicated region body
PF: predicated region fallthrough
CT: control target
= control target key end

     0   :  { %vm94_vm0 = vcmask 1042432   ;;  %v399_v2 = vmov 0.0   ;;  %vm400_vm1 = vmmov 0   ;;  %vm72_vm2 = vcmask 23552   ;;  %s518_s0 = inlined_call_operand.vmem [shape: f32[3,128], index: 0, kind: input, shape index: {}]   ;;  %s519_s1 = inlined_call_operand.vmem [shape: f32[50,3], index: 1, kind: input, shape index: {}]   ;;  %s520_s2 = inlined_call_operand.vmem [shape: f32[50,1], index: 2, kind: input, shape index: {}]   ;;  %s521_s3 = inlined_call_operand.vmem [shape: f32[1,50], index: 3, kind: input, shape index: {}]   ;;  %s522_s4 = inlined_call_operand.<no memory space> [shape: f32[1,1], index: 4, kind: input, shape index: {}]   ;;  %s523_s5 = inlined_call_operand.hbm [shape: f32[1,128], index: 5, kind: output, shape index: {}]  }
   0x1   :  { %v22_v0 = vld [vmem:[%s518_s0] sm:$0x7]  ;;  %329 = vmatprep.subr.mxu0 %v399_v2  ;;  %331 = vmatprep.mubr.msk.f32.mxu0 %vm400_vm1, %v399_v2  ;;  %v401_v3 = vmov 0   ;;  %v36_v4 = vld [vmem:[%s520_s2 + $0x30] sm:$0x3]  ;;  %v24_v6 = vld [vmem:[%s519_s1 + $0x8] sm:$0xff] }
   0x2   :  { %v23_v1 = vld [vmem:[%s519_s1] sm:$0xff]  ;;  %330 = vmatpush3.msk.msra.mxu0 %vm94_vm0, %v22_v0  ;;  %373 = vset.pattern.permute.xlu0 %v401_v3  ;;  %v35_v7 = vld [vmem:[%s520_s2 + $0x28] sm:$0xff] }
   0x3   :  { %332 = vmatmul.mubr.msk.f32.vlgmr.msra.gmra.mxu0 %vm72_vm2, %v23_v1  ;;  %374 = vset.pattern.permute.xlu1 %v401_v3  ;;  %v34_v5 = vld [vmem:[%s520_s2 + $0x20] sm:$0xff] }
   0x4   :  { %334 = vmatprep.mubr.msk.f32.mxu0 %vm400_vm1, %v399_v2  ;;  %69 = vperm.xlu0 %373, %v36_v4  }
   0x5   :  { %59 = vperm.xlu1 %374, %v34_v5   ;;  %352 = vmatprep.subr.mxu1 %v399_v2 }
   0x6   :  { %11 = vsyncpa [#allocation4], 0  ;;  %v33_v8 = vld [vmem:[%s520_s2 + $0x18] sm:$0xff]  ;;  %366 = vmatprep.mubr.msk.f32.mxu1 %vm400_vm1, %v399_v2  ;;  %v25_v9 = vld [vmem:[%s519_s1 + $0x10] sm:$0xff]  ;;  %vm212_vm3 = vcmask 1041408   ;;  %vm208_vm4 = vcmask 408576   ;;  %v207_v53 = vstv %s522_s4 }
   0x7   :  { %335 = vmatmul.mubr.msk.f32.gmra.mxu0 %vm72_vm2, %v24_v6  ;;  %v32_v10 = vld [vmem:[%s520_s2 + $0x10] sm:$0xff]  ;;  %v31_v11 = vld [vmem:[%s520_s2 + $0x8] sm:$0xff]  ;;  %v26_v12 = vld [vmem:[%s519_s1 + $0x18] sm:$0xff]  ;;  %s402_s23 = smov [#allocation3]  }
   0x8   :  { %337 = vmatprep.mubr.msk.f32.mxu0 %vm400_vm1, %v399_v2  ;;  %64 = vperm.xlu0 %373, %v35_v7   ;;  %v30_v13 = vld [vmem:[%s520_s2] sm:$0xff]  ;;  %v28_v15 = vld [vmem:[%s519_s1 + $0x28] sm:$0xff]  ;;  %v29_v16 = vld [vmem:[%s519_s1 + $0x30] sm:$0x3]  ;;  %s295_s24 = sshll.u32 %s402_s23, 4  ;;  %s296_s24 = int_to_ptr.vmem [resolvable:$true] %s295_s24 }
   0x9   :  { %54 = vperm.xlu1 %374, %v33_v8   ;;  %v27_v14 = vld [vmem:[%s519_s1 + $0x20] sm:$0xff]  ;;  %s381_s25 = scalar_lea.vmem %s296_s24, 32  ;;  %p382_p1 = scmp.lt.s32.totalorder %s296_s24, %s296_s24 }
   0xa   :  { %v205_v52 = vld [vmem:[%s521_s3] sm:$0x1]  ;;  %s377_s3 = scalar_lea.vmem %s296_s24, 16 }
   0xb   :  { %338 = vmatmul.mubr.msk.f32.gmra.mxu0 %vm72_vm2, %v25_v9  ;;  %p378_p0 = scmp.ne.s32.totalorder %s296_s24, %s377_s3  ;;  %p383_p2 = scmp.lt.s32.totalorder %s381_s25, %s377_s3 }
   0xc   :  { %340 = vmatprep.mubr.msk.f32.mxu0 %vm400_vm1, %v399_v2  ;;  %49 = vperm.xlu0 %373, %v32_v10  }
   0xd   :  { %44 = vperm.xlu1 %374, %v31_v11   ;;  %p384_p3 = por %p383_p2, %p382_p1 }
   0xf   :  { %341 = vmatmul.mubr.msk.f32.gmra.mxu0 %vm72_vm2, %v26_v12  ;;  %p385_p4 = pnand %p384_p3, %p378_p0 }
  0x10   :  { %343 = vmatprep.mubr.msk.f32.mxu0 %vm400_vm1, %v399_v2  ;;  %39 = vperm.xlu0 %373, %v30_v13  }
  0x13   :  { %344 = vmatmul.mubr.msk.f32.gmra.mxu0 %vm72_vm2, %v27_v14 }
  0x14   :  { %346 = vmatprep.mubr.msk.f32.mxu0 %vm400_vm1, %v399_v2 }
  0x17   :  { %347 = vmatmul.mubr.msk.f32.gmra.mxu0 %vm72_vm2, %v28_v15 }
  0x18   :  { %349 = vmatprep.mubr.msk.f32.mxu0 %vm400_vm1, %v399_v2 }
  0x1b   :  { %350 = vmatmul.mubr.msk.f32.gmra.mxu0 %vm72_vm2, %v29_v16 }
  0x7f   :  { %v70_v24 = vpop.permute.xlu0 %69 }
  0x80   :  { %v60_v27 = vpop.permute.xlu1 %59 }
  0x83   :  { %v65_v29 = vpop.permute.xlu0 %64 }
  0x84   :  { %v55_v32 = vpop.permute.xlu1 %54 }
  0x87   :  { %v50_v36 = vpop.permute.xlu0 %49 }
  0x88   :  { %v45_v42 = vpop.permute.xlu1 %44 }
  0x8b   :  { %v40_v45 = vpop.permute.xlu0 %39 }
  0xc3   :  { %v164_v17 = vpop.f32.mrf.mxu0 }
  0xc4   :  { %v165_v48 = vadd.f32 %v164_v17, %v40_v45 }
  0xc5   :  { %v333_v18 = vpop.f32.mrf.mxu0 }
  0xc6   :  { %v198_v51 = vmax.f32 %v165_v48, 0.0 }
  0xc7   :  { %v169_v19 = vpop.f32.mrf.mxu0 }
  0xc8   :  { %v170_v46 = vadd.f32 %v169_v19, %v45_v42 }
  0xc9   :  { %v336_v20 = vpop.f32.mrf.mxu0 }
  0xca   :  { %v199_v50 = vmax.f32 %v170_v46, 0.0 }
  0xcb   :  { %v174_v21 = vpop.f32.mrf.mxu0 }
  0xcc   :  { %v175_v43 = vadd.f32 %v174_v21, %v50_v36 }
  0xcd   :  { %v339_v22 = vpop.f32.mrf.mxu0 }
  0xce   :  { %v200_v49 = vmax.f32 %v175_v43, 0.0 }
  0xcf   :  { %v179_v23 = vpop.f32.mrf.mxu0 }
  0xd0   :  { %v180_v40 = vadd.f32 %v179_v23, %v55_v32 }
  0xd1   :  { %v342_v25 = vpop.f32.mrf.mxu0 }
  0xd2   :  { %v201_v47 = vmax.f32 %v180_v40, 0.0 }
  0xd3   :  { %v184_v26 = vpop.f32.mrf.mxu0 }
  0xd4   :  { %v185_v38 = vadd.f32 %v184_v26, %v60_v27 }
  0xd5   :  { %v345_v28 = vpop.f32.mrf.mxu0 }
  0xd6   :  { %v202_v44 = vmax.f32 %v185_v38, 0.0 }
  0xd7   :  { %v189_v30 = vpop.f32.mrf.mxu0 }
  0xd8   :  { %v190_v34 = vadd.f32 %v189_v30, %v65_v29 }
  0xd9   :  { %v348_v31 = vpop.f32.mrf.mxu0 }
  0xda   :  { %v203_v41 = vmax.f32 %v190_v34, 0.0 }
  0xdb   :  { %v194_v33 = vpop.f32.mrf.mxu0 }
  0xdc   :  { %v195_v35 = vadd.f32 %v194_v33, %v70_v24 }
  0xdd   :  { %v351_v37 = vpop.f32.mrf.mxu0 }
  0xde   :  { %v204_v39 = vmax.f32 %v195_v35, 0.0 }
  0xe0   :  { %353 = vmatpush3.msk.msra.mxu1 %vm212_vm3, %v204_v39 }
  0xe1   :  { %354 = vmatprep.subr.mxu1 %v399_v2 }
  0xe2   :  { %355 = vmatpush3.msra.mxu1 %v203_v41 }
  0xe3   :  { %356 = vmatprep.subr.mxu1 %v399_v2 }
  0xe4   :  { %357 = vmatpush3.msra.mxu1 %v202_v44 }
  0xe5   :  { %358 = vmatprep.subr.mxu1 %v399_v2 }
  0xe6   :  { %359 = vmatpush3.msra.mxu1 %v201_v47 }
  0xe7   :  { %360 = vmatprep.subr.mxu1 %v399_v2 }
  0xe8   :  { %361 = vmatpush3.msra.mxu1 %v200_v49 }
  0xe9   :  { %362 = vmatprep.subr.mxu1 %v399_v2 }
  0xea   :  { %363 = vmatpush3.msra.mxu1 %v199_v50 }
  0xeb   :  { %364 = vmatprep.subr.mxu1 %v399_v2 }
  0xec   :  { %365 = vmatpush3.msra.mxu1 %v198_v51 }
  0xed   :  { %367 = vmatmul.mubr.msk.f32.vlgmr.msra.gmra.mxu1 %vm208_vm4, %v205_v52 }
 0x1ad   :  { %v282_v54 = vpop.f32.mrf.mxu1 }
 0x1ae   :  { %v283_v55 = vadd.f32 %v282_v54, %v207_v53 }
 0x1af   :  { %v368_v56 = vpop.f32.mrf.mxu1 }
 0x1b0   :  { %v286_v57 = vmul.f32 1.442695, %v283_v55 }
 0x1b2   :  { %375 = vpow2.f32 %v286_v57 }
 0x1bf   :  { %v376_v58 = vpop.eup %375 }
 0x1c0   :  { %288 = vst [vmem:[#allocation3] sm:$0x1] %v376_v58 }
 0x1c1   :  { %388 = shalt.err (!%p385_p4)
}
 0x1c2   :  { %298 = dma.vmem_to_hbm [thread:$0]  %s296_s24, 16, %s523_s5, [#allocation4]  }
 0x1c3   :  { %397 = dma.done.wait [#allocation4], 16  }
 0x1c4   :  { %398 = vsyncadd [#allocation4], 4294967280 }
 0x1c5   :  { %302 = vsyncpa [#allocation4], 1 }

</bundles_post_ra>
